<compile_context>
chip_gen: v5e
topology: v5e:2x2
jax: 0.10.0
libtpu: 0.0.40
codegen_flags: <defaults>
</compile_context>

<pallas_src>
import functools

import jax
import jax.numpy as jnp
from jax.experimental import pallas as pl
from jax.experimental.pallas import tpu as pltpu


def _default_vmem_limit():
    """~75% of physical VMEM, capped at 96 MiB (v5e/v6e 128 MiB, v7x 64 MiB)."""
    try:
        cap = getattr(pltpu.get_tpu_info(), "vmem_capacity_bytes", 64 * 1024 * 1024)
    except Exception:  # no TPU info available at import time
        cap = 64 * 1024 * 1024
    return int(min(cap * 3 // 4, 96 * 1024 * 1024))


_VMEM_LIMIT_BYTES = _default_vmem_limit()


def _pick_spatial_tile(hw, tile_hw):
    """Largest lane-dense tile that DIVIDES hw (no padded last grid step).

    Prefers multiples of 256 (full 2x256x256 MXU pass on v6e/v7x), falls back
    to multiples of 128 (sufficient for v5e's 4x128x128 MXUs).  If hw is not
    lane-aligned, the full extent is the only legal lane-dense block."""
    if hw <= tile_hw or hw % 128 != 0:
        return hw
    for align in (256, 128):
        best = 0
        cand = align
        while cand <= tile_hw:
            if hw % cand == 0:
                best = cand
            cand += align
        if best:
            return best
    return hw


def _pick_d_chunk(d, d_chunk):
    """Largest multiple-of-128 divisor of d that is <= d_chunk (128-aligned so
    the (C, Dc) w2 block keeps a legal lane-dense last dim).  Falls back to the
    full hidden dim when no such divisor exists."""
    if d <= d_chunk:
        return d
    best = 0
    cand = 128
    while cand <= d_chunk:
        if d % cand == 0:
            best = cand
        cand += 128
    return best if best else d


def _spec(block_shape, index_map, single_buffer=False):
    """BlockSpec helper; requests single buffering for grid-invariant blocks
    when the running JAX version supports pipeline_mode=pl.Buffered(...)."""
    if single_buffer and hasattr(pl, "Buffered"):
        try:
            return pl.BlockSpec(block_shape, index_map,
                                pipeline_mode=pl.Buffered(1))
        except (TypeError, ValueError):
            pass
    return pl.BlockSpec(block_shape, index_map)


def _mlp_kernel(x_ref, w1_ref, b1_ref, w3_ref, b3_ref, w2_ref, b2_ref,
                o_ref, acc_ref, *, matmul_dtype):
    # x_ref : (C, T)    channel-major tile of pixels
    # w1_ref: (Dc, C)   chunk of PyTorch Linear weight (out, in), matmul_dtype
    # b1_ref: (Dc, 1)   f32
    # w3_ref: (Dc, C), b3_ref: (Dc, 1)
    # w2_ref: (C, Dc)   matmul_dtype
    # b2_ref: (C, 1)    f32
    # o_ref : (C, T)
    # acc_ref: (C, T)   f32 VMEM accumulator over the D-chunk axis
    d = pl.program_id(2)

    @pl.when(d == 0)
    def _():
        acc_ref[...] = jnp.zeros_like(acc_ref)

    x = x_ref[...].astype(matmul_dtype)   # (C, T); no-op for the f32 path

    # Gate and value branches (contraction over C), f32 accumulation on MXU.
    h1 = jnp.dot(w1_ref[...], x, preferred_element_type=jnp.float32) + b1_ref[...]
    h3 = jnp.dot(w3_ref[...], x, preferred_element_type=jnp.float32) + b3_ref[...]

    # SiLU(h1) * h3: exp and approx-reciprocal both run on the EUP slot.
    sig = pl.reciprocal(1.0 + jnp.exp(-h1), approx=True)
    g = (h1 * sig) * h3                                              # (Dc, T) f32

    # Down-projection chunk, accumulated over the D grid axis.
    acc_ref[...] += jnp.dot(w2_ref[...], g.astype(matmul_dtype),
                            preferred_element_type=jnp.float32)

    @pl.when(d == pl.num_programs(2) - 1)
    def _():
        o_ref[...] = (acc_ref[...] + b2_ref[...]).astype(o_ref.dtype)


@functools.partial(jax.jit,
                   static_argnames=("tile_hw", "d_chunk", "use_bf16_matmul"))
def mlp_pallas(x_nchw, w1, b1, w3, b3, w2, b2,
               tile_hw=2048, d_chunk=512, use_bf16_matmul=True):
    """x_nchw: (N, C, H, W).  Weights in PyTorch Linear layout:
       w1,w3: (D, C); b1,b3: (D,); w2: (C, D); b2: (C,).  Returns (N, C, H, W)."""
    N, C, H, W = x_nchw.shape
    D = w1.shape[0]
    HW = H * W

    # Free reshape (no transpose): NCHW -> (N, C, H*W), channel-major pixels.
    x3 = x_nchw.reshape(N, C, HW)

    t = _pick_spatial_tile(HW, tile_hw)
    num_t = pl.cdiv(HW, t)            # t divides HW -> no padded last step
    Dc = _pick_d_chunk(D, d_chunk)
    num_d = pl.cdiv(D, Dc)            # Dc divides D

    matmul_dtype = jnp.bfloat16 if use_bf16_matmul else x_nchw.dtype

    # Pre-cast weights once in the wrapper (halves DMA/VMEM, no per-step cast).
    w1m = w1.astype(matmul_dtype)
    w3m = w3.astype(matmul_dtype)
    w2m = w2.astype(matmul_dtype)
    # Biases stay f32 (added to the f32 accumulators), shaped as columns so
    # they broadcast over the pixel lanes.
    b1c = b1.reshape(D, 1).astype(jnp.float32)
    b3c = b3.reshape(D, 1).astype(jnp.float32)
    b2c = b2.reshape(C, 1).astype(jnp.float32)

    # Blocks whose index_map is constant are single-buffered.
    weights_invariant = (num_d == 1)

    kernel = functools.partial(_mlp_kernel, matmul_dtype=matmul_dtype)

    out3 = pl.pallas_call(
        kernel,
        out_shape=jax.ShapeDtypeStruct((N, C, HW), x_nchw.dtype),
        grid_spec=pltpu.PrefetchScalarGridSpec(
            num_scalar_prefetch=0,
            # D-chunk (reduction) axis last; x/out block indices are constant
            # across it so they are not re-fetched per D step.
            grid=(N, num_t, num_d),
            in_specs=[
                pl.BlockSpec((None, C, t), lambda n, i, d: (n, 0, i)),       # x
                _spec((Dc, C), lambda n, i, d: (d, 0), weights_invariant),   # w1
                _spec((Dc, 1), lambda n, i, d: (d, 0), weights_invariant),   # b1
                _spec((Dc, C), lambda n, i, d: (d, 0), weights_invariant),   # w3
                _spec((Dc, 1), lambda n, i, d: (d, 0), weights_invariant),   # b3
                _spec((C, Dc), lambda n, i, d: (0, d), weights_invariant),   # w2
                _spec((C, 1), lambda n, i, d: (0, 0), True),                 # b2
            ],
            out_specs=pl.BlockSpec((None, C, t), lambda n, i, d: (n, 0, i)),
            scratch_shapes=[pltpu.VMEM((C, t), jnp.float32)],                # acc
        ),
        compiler_params=pltpu.CompilerParams(
            dimension_semantics=("parallel", "parallel", "arbitrary"),
            vmem_limit_bytes=_VMEM_LIMIT_BYTES,
        ),
    )(x3, w1m, b1c, w3m, b3c, w2m, b2c)

    return out3.reshape(N, C, H, W)


def _mlp_reference(x_nchw, w1, b1, w3, b3, w2, b2):
    """Pure-JAX reference mirroring the PyTorch forward exactly."""
    N, C, H, W = x_nchw.shape
    with jax.default_matmul_precision("highest"):
        x = jnp.transpose(x_nchw, (0, 2, 3, 1)).reshape(-1, C)
        h1 = x @ w1.T + b1
        h3 = x @ w3.T + b3
        y = (jax.nn.silu(h1) * h3) @ w2.T + b2
    return jnp.transpose(y.reshape(N, H, W, C), (0, 3, 1, 2))


if __name__ == "__main__":
    # Small shapes consistent with MLP(dim, mlp_ratio) on an NCHW feature map.
    # dim=32, mlp_ratio=8 gives D=256 so the D-chunk reduction axis (d_chunk=128
    # -> num_d=2) and the spatial tiling (tile_hw=128 -> num_t=2) are both
    # exercised: grid = (2, 2, 2).
    N, dim, H, W = 2, 32, 16, 16
    mlp_ratio = 8.0
    D = int(mlp_ratio * dim)

    key = jax.random.PRNGKey(0)
    k = jax.random.split(key, 7)

    x = jax.random.normal(k[0], (N, dim, H, W), dtype=jnp.float32)

    # PyTorch Linear default init: U(-1/sqrt(fan_in), 1/sqrt(fan_in))
    lim1 = 1.0 / (dim ** 0.5)
    w1 = jax.random.uniform(k[1], (D, dim), minval=-lim1, maxval=lim1, dtype=jnp.float32)
    b1 = jax.random.uniform(k[2], (D,), minval=-lim1, maxval=lim1, dtype=jnp.float32)
    w3 = jax.random.uniform(k[3], (D, dim), minval=-lim1, maxval=lim1, dtype=jnp.float32)
    b3 = jax.random.uniform(k[4], (D,), minval=-lim1, maxval=lim1, dtype=jnp.float32)
    lim2 = 1.0 / (D ** 0.5)
    w2 = jax.random.uniform(k[5], (dim, D), minval=-lim2, maxval=lim2, dtype=jnp.float32)
    b2 = jax.random.uniform(k[6], (dim,), minval=-lim2, maxval=lim2, dtype=jnp.float32)

    ref = _mlp_reference(x, w1, b1, w3, b3, w2, b2)

    # Default (bf16 MXU) path.
    out_bf16 = mlp_pallas(x, w1, b1, w3, b3, w2, b2,
                          tile_hw=128, d_chunk=128, use_bf16_matmul=True)
    out_bf16 = jax.block_until_ready(out_bf16)

    # Full-precision path (f32 inputs on the MXU).
    out_f32 = mlp_pallas(x, w1, b1, w3, b3, w2, b2,
                         tile_hw=128, d_chunk=128, use_bf16_matmul=False)
    out_f32 = jax.block_until_ready(out_f32)

    assert out_bf16.shape == (N, dim, H, W)
    assert out_f32.shape == (N, dim, H, W)
    assert jnp.allclose(out_f32, ref, atol=2e-3, rtol=2e-3), \
        float(jnp.max(jnp.abs(out_f32 - ref)))
    assert jnp.allclose(out_bf16, ref, atol=5e-2, rtol=5e-2), \
        float(jnp.max(jnp.abs(out_bf16 - ref)))

    print("KERNEL_OK")
</pallas_src>

<mosaic_0001>
module attributes {stable_mosaic.version = 11 : i64} {
  func.func @_mlp_kernel(%arg0: i32, %arg1: i32, %arg2: i32, %arg3: memref<1x32x128xf32, #tpu.memory_space<vmem>>, %arg4: memref<128x32xbf16, #tpu.memory_space<vmem>>, %arg5: memref<128x1xf32, #tpu.memory_space<vmem>>, %arg6: memref<128x32xbf16, #tpu.memory_space<vmem>>, %arg7: memref<128x1xf32, #tpu.memory_space<vmem>>, %arg8: memref<32x128xbf16, #tpu.memory_space<vmem>>, %arg9: memref<32x1xf32, #tpu.memory_space<vmem>>, %arg10: memref<1x32x128xf32, #tpu.memory_space<vmem>>, %arg11: memref<32x128xf32, #tpu.memory_space<vmem>>) attributes {dimension_semantics = [#tpu.dimension_semantics<parallel>, #tpu.dimension_semantics<parallel>, #tpu.dimension_semantics<arbitrary>], iteration_bounds = array<i64: 2, 2, 2>, scalar_prefetch = 0 : i64, scratch_operands = 1 : i64, tpu.core_type = #tpu.core_type<tc>, window_params = [{transform_indices = @transform_0, window_bounds = array<i64: 1, 32, 128>}, {transform_indices = @transform_1, window_bounds = array<i64: 128, 32>}, {transform_indices = @transform_2, window_bounds = array<i64: 128, 1>}, {transform_indices = @transform_3, window_bounds = array<i64: 128, 32>}, {transform_indices = @transform_4, window_bounds = array<i64: 128, 1>}, {transform_indices = @transform_5, window_bounds = array<i64: 32, 128>}, {pipeline_mode = #tpu.pipeline_mode<synchronous>, transform_indices = @transform_6, window_bounds = array<i64: 32, 1>}, {transform_indices = @transform_7, window_bounds = array<i64: 1, 32, 128>}]} {
    %c0_i32 = arith.constant 0 : i32
    %0 = arith.cmpi eq, %arg2, %c0_i32 : i32
    %1 = arith.extui %0 : i1 to i32
    %c0_i32_0 = arith.constant 0 : i32
    %2 = arith.cmpi ne, %1, %c0_i32_0 : i32
    scf.if %2 {
      %cst_22 = arith.constant 0.000000e+00 : f32
      %33 = vector.broadcast %cst_22 : f32 to vector<32x128xf32>
      %c0_23 = arith.constant 0 : index
      %c0_24 = arith.constant 0 : index
      %34 = vector.load %arg11[%c0_23, %c0_24] : memref<32x128xf32, #tpu.memory_space<vmem>>, vector<32x128xf32>
      tpu.vector_store %arg11[%c0_23, %c0_24], %33 {strides = array<i32>} : memref<32x128xf32, #tpu.memory_space<vmem>>, vector<32x128xf32>,
    } else {
    }
    %c0 = arith.constant 0 : index
    %c0_1 = arith.constant 0 : index
    %c0_2 = arith.constant 0 : index
    %3 = vector.load %arg3[%c0, %c0_1, %c0_2] : memref<1x32x128xf32, #tpu.memory_space<vmem>>, vector<1x32x128xf32>
    %4 = vector.shape_cast %3 : vector<1x32x128xf32> to vector<32x128xf32>
    %5 = arith.truncf %4 : vector<32x128xf32> to vector<32x128xbf16>
    %c0_3 = arith.constant 0 : index
    %c0_4 = arith.constant 0 : index
    %6 = vector.load %arg4[%c0_3, %c0_4] : memref<128x32xbf16, #tpu.memory_space<vmem>>, vector<128x32xbf16>
    %cst = arith.constant dense<0.000000e+00> : vector<128x128xf32>
    %7 = tpu.matmul %6, %5, %cst {dimension_numbers = #tpu.dot_dimension_numbers<[1], [0], [0], [1], [0, 0, 1, 1], [], []>} : vector<128x32xbf16>, vector<32x128xbf16>, vector<128x128xf32> -> vector<128x128xf32>
    %c0_5 = arith.constant 0 : index
    %c0_6 = arith.constant 0 : index
    %8 = vector.load %arg5[%c0_5, %c0_6] : memref<128x1xf32, #tpu.memory_space<vmem>>, vector<128x1xf32>
    %9 = vector.broadcast %8 : vector<128x1xf32> to vector<128x128xf32>
    %10 = arith.addf %7, %9 : vector<128x128xf32>
    %c0_7 = arith.constant 0 : index
    %c0_8 = arith.constant 0 : index
    %11 = vector.load %arg6[%c0_7, %c0_8] : memref<128x32xbf16, #tpu.memory_space<vmem>>, vector<128x32xbf16>
    %cst_9 = arith.constant dense<0.000000e+00> : vector<128x128xf32>
    %12 = tpu.matmul %11, %5, %cst_9 {dimension_numbers = #tpu.dot_dimension_numbers<[1], [0], [0], [1], [0, 0, 1, 1], [], []>} : vector<128x32xbf16>, vector<32x128xbf16>, vector<128x128xf32> -> vector<128x128xf32>
    %c0_10 = arith.constant 0 : index
    %c0_11 = arith.constant 0 : index
    %13 = vector.load %arg7[%c0_10, %c0_11] : memref<128x1xf32, #tpu.memory_space<vmem>>, vector<128x1xf32>
    %14 = vector.broadcast %13 : vector<128x1xf32> to vector<128x128xf32>
    %15 = arith.addf %12, %14 : vector<128x128xf32>
    %cst_12 = arith.constant 0.000000e+00 : f32
    %16 = vector.broadcast %cst_12 : f32 to vector<128x128xf32>
    %17 = arith.subf %16, %10 : vector<128x128xf32>
    %18 = math.exp %17 : vector<128x128xf32>
    %cst_13 = arith.constant 1.000000e+00 : f32
    %19 = vector.broadcast %cst_13 : f32 to vector<128x128xf32>
    %20 = arith.addf %19, %18 : vector<128x128xf32>
    %21 = tpu.reciprocal %20 {approx = true} : vector<128x128xf32> -> vector<128x128xf32>
    %22 = arith.mulf %10, %21 : vector<128x128xf32>
    %23 = arith.mulf %22, %15 : vector<128x128xf32>
    %c0_14 = arith.constant 0 : index
    %c0_15 = arith.constant 0 : index
    %24 = vector.load %arg11[%c0_14, %c0_15] : memref<32x128xf32, #tpu.memory_space<vmem>>, vector<32x128xf32>
    %c0_16 = arith.constant 0 : index
    %c0_17 = arith.constant 0 : index
    %25 = vector.load %arg8[%c0_16, %c0_17] : memref<32x128xbf16, #tpu.memory_space<vmem>>, vector<32x128xbf16>
    %26 = arith.truncf %23 : vector<128x128xf32> to vector<128x128xbf16>
    %cst_18 = arith.constant dense<0.000000e+00> : vector<32x128xf32>
    %27 = tpu.matmul %25, %26, %cst_18 {dimension_numbers = #tpu.dot_dimension_numbers<[1], [0], [0], [1], [0, 0, 1, 1], [], []>} : vector<32x128xbf16>, vector<128x128xbf16>, vector<32x128xf32> -> vector<32x128xf32>
    %28 = arith.addf %24, %27 : vector<32x128xf32>
    %c0_19 = arith.constant 0 : index
    %c0_20 = arith.constant 0 : index
    %29 = vector.load %arg11[%c0_19, %c0_20] : memref<32x128xf32, #tpu.memory_space<vmem>>, vector<32x128xf32>
    tpu.vector_store %arg11[%c0_19, %c0_20], %28 {strides = array<i32>} : memref<32x128xf32, #tpu.memory_space<vmem>>, vector<32x128xf32>,
    %c1_i32 = arith.constant 1 : i32
    %30 = arith.cmpi eq, %arg2, %c1_i32 : i32
    %31 = arith.extui %30 : i1 to i32
    %c0_i32_21 = arith.constant 0 : i32
    %32 = arith.cmpi ne, %31, %c0_i32_21 : i32
    scf.if %32 {
      %c0_22 = arith.constant 0 : index
      %c0_23 = arith.constant 0 : index
      %33 = vector.load %arg11[%c0_22, %c0_23] : memref<32x128xf32, #tpu.memory_space<vmem>>, vector<32x128xf32>
      %c0_24 = arith.constant 0 : index
      %c0_25 = arith.constant 0 : index
      %34 = vector.load %arg9[%c0_24, %c0_25] : memref<32x1xf32, #tpu.memory_space<vmem>>, vector<32x1xf32>
      %35 = vector.broadcast %34 : vector<32x1xf32> to vector<32x128xf32>
      %36 = arith.addf %33, %35 : vector<32x128xf32>
      %c0_26 = arith.constant 0 : index
      %c0_27 = arith.constant 0 : index
      %c0_28 = arith.constant 0 : index
      %37 = vector.load %arg10[%c0_26, %c0_27, %c0_28] : memref<1x32x128xf32, #tpu.memory_space<vmem>>, vector<1x32x128xf32>
      %38 = vector.shape_cast %37 : vector<1x32x128xf32> to vector<32x128xf32>
      %39 = vector.shape_cast %36 : vector<32x128xf32> to vector<1x32x128xf32>
      tpu.vector_store %arg10[%c0_26, %c0_27, %c0_28], %39 {strides = array<i32>} : memref<1x32x128xf32, #tpu.memory_space<vmem>>, vector<1x32x128xf32>,
    } else {
    }
    return
  }
  func.func @transform_0(%arg0: i32, %arg1: i32, %arg2: i32) -> (i32, i32, i32) {
    %c0_i32 = arith.constant 0 : i32
    %c0_i32_0 = arith.constant 0 : i32
    return %arg0, %c0_i32, %arg1 : i32, i32, i32
  }
  func.func @transform_1(%arg0: i32, %arg1: i32, %arg2: i32) -> (i32, i32) {
    %c0_i32 = arith.constant 0 : i32
    %c0_i32_0 = arith.constant 0 : i32
    return %arg2, %c0_i32 : i32, i32
  }
  func.func @transform_2(%arg0: i32, %arg1: i32, %arg2: i32) -> (i32, i32) {
    %c0_i32 = arith.constant 0 : i32
    %c0_i32_0 = arith.constant 0 : i32
    return %arg2, %c0_i32 : i32, i32
  }
  func.func @transform_3(%arg0: i32, %arg1: i32, %arg2: i32) -> (i32, i32) {
    %c0_i32 = arith.constant 0 : i32
    %c0_i32_0 = arith.constant 0 : i32
    return %arg2, %c0_i32 : i32, i32
  }
  func.func @transform_4(%arg0: i32, %arg1: i32, %arg2: i32) -> (i32, i32) {
    %c0_i32 = arith.constant 0 : i32
    %c0_i32_0 = arith.constant 0 : i32
    return %arg2, %c0_i32 : i32, i32
  }
  func.func @transform_5(%arg0: i32, %arg1: i32, %arg2: i32) -> (i32, i32) {
    %c0_i32 = arith.constant 0 : i32
    %c0_i32_0 = arith.constant 0 : i32
    return %c0_i32, %arg2 : i32, i32
  }
  func.func @transform_6(%arg0: i32, %arg1: i32, %arg2: i32) -> (i32, i32) {
    %c0_i32 = arith.constant 0 : i32
    %c0_i32_0 = arith.constant 0 : i32
    %c0_i32_1 = arith.constant 0 : i32
    return %c0_i32, %c0_i32_0 : i32, i32
  }
  func.func @transform_7(%arg0: i32, %arg1: i32, %arg2: i32) -> (i32, i32, i32) {
    %c0_i32 = arith.constant 0 : i32
    %c0_i32_0 = arith.constant 0 : i32
    return %arg0, %c0_i32, %arg1 : i32, i32, i32
  }
}

</mosaic_0001>

<bundles_post_ra>
// kernel: mlp_pallas.1
= control target key start
LH: loop header
LB: loop body
LE: loop exit
PB: predicated region body
PF: predicated region fallthrough
CT: control target
= control target key end

     0   :  { %s2255_s0 = inlined_call_operand.vmem [shape: f32[2,32,256], index: 0, kind: input, shape index: {}]   ;;  %s2256_s1 = inlined_call_operand.vmem [shape: bf16[256,32], index: 1, kind: input, shape index: {}]   ;;  %s2257_s2 = inlined_call_operand.vmem [shape: f32[256,1], index: 2, kind: input, shape index: {}]   ;;  %s2258_s3 = inlined_call_operand.vmem [shape: bf16[256,32], index: 3, kind: input, shape index: {}]   ;;  %s2259_s4 = inlined_call_operand.vmem [shape: f32[256,1], index: 4, kind: input, shape index: {}]   ;;  %s2260_s5 = inlined_call_operand.vmem [shape: bf16[32,256], index: 5, kind: input, shape index: {}]   ;;  %s2261_s6 = inlined_call_operand.vmem [shape: f32[32,1], index: 6, kind: input, shape index: {}]   ;;  %s2262_s7 = inlined_call_operand.vmem [shape: f32[2,32,256], index: 7, kind: output, shape index: {}]  }
   0x1   :  { %2269 = sst [smem:[#allocation13_spill]] %s2255_s0 }
   0x2   :  { %2270 = sst [smem:[#allocation14_spill]] %s2260_s5 }
   0x3   :  { %2271 = sst [smem:[#allocation15_spill]] %s2262_s7 }
   0x4   :  { %s1812_s24 = smov 0   ;;  %s1814_s25 = smov 0  }
   0x5   :  { %s1816_s26 = smov 0   ;;  %s1818_s27 = smov 0  }
   0x6   :  { %s1820_s28 = smov 0   ;;  %s1822_s29 = smov 0  }
   0x7   :  { %s1824_s30 = smov 0   ;;  %s1826_s8 = smov 0  }
   0x8   :  { %s1828_s9 = smov 0   ;;  %s1830_s10 = smov 0  }
   0x9   :  { %s1832_s11 = smov 0  }
   0xa LB: > { %2272 = sst [smem:[#allocation6_spill]] %s1755_s8  ;;  %s29_s12 = sadd.s32 1, %s1755_s8  ;;  %s1767_s11 = sphi %s1832_s11, %s17_s11   ;;  %s1763_s10 = sphi %s1830_s10, %s2291_s10   ;;  %s1759_s9 = sphi %s1828_s9, %s2290_s9   ;;  %s1755_s8 = sphi %s1826_s8, %s2289_s8   ;;  %s1751_s30 = sphi %s1824_s30, %s2297_s30   ;;  %s1747_s29 = sphi %s1822_s29, %s2296_s29   ;;  %s1743_s28 = sphi %s1820_s28, %s2286_s28   ;;  %s1739_s27 = sphi %s1818_s27, %s2295_s27   ;;  %s1735_s26 = sphi %s1816_s26, %s2294_s26   ;;  %s1731_s25 = sphi %s1814_s25, %s2293_s25   ;;  %s1727_s24 = sphi %s1812_s24, %s2292_s24  }
   0xb   : > { %2273 = sst [smem:[#allocation7_spill]] %s1759_s9  ;;  %p30_p0 = scmp.ge.s32.totalorder %s29_s12, 2 }
   0xc   : > { %2274 = sst [smem:[#allocation8_spill]] %s1763_s10  ;;  %s32_s13 = sadd.s32 1, %s1759_s9 }
   0xd   : > { %s1381_s14 = sadd.s32 4294967295, %s1767_s11   ;;  %s36_s15 = sadd.s32 1, %s1763_s10 }
   0xe   : > { %s2299_s12 = smov (%p30_p0, %s29_s12), 0  ;;  %s2301_s13 = smov (!%p30_p0, %s32_s13), %s1759_s9 }
   0xf   : > { %2275 = sst [smem:[#allocation9_spill]] %s2299_s12  ;;  %p52_p1 = scmp.ne.s32.totalorder %s1739_s27, %s1735_s26 }
  0x10   : > { %p53_p2 = scmp.eq.s32.totalorder %s1767_s11, 0  ;;  %p34_p3 = scmp.ge.s32.totalorder %s2301_s13, 2 }
  0x11   : > { %s172_s16 = ssub.s32 %s1755_s8, %s2299_s12  ;;  %s175_s19 = sadd.s32 1, %s1731_s25 }
  0x12   : > { %p1884_p4 = por %p53_p2, %p52_p1  ;;  %p173_p5 = scmp.eq.s32.totalorder %s172_s16, 0 }
  0x13   : > { %s2303_s13 = smov (%p34_p3, %s2301_s13), 0  ;;  %s2305_s15 = smov (!%p34_p3, %s36_s15), %s1763_s10 }
  0x14   : > { %2277 = sst [smem:[#allocation10_spill]] %s2303_s13  ;;  %s41_s18 = ssub.s32 %s1759_s9, %s2303_s13 }
  0x15   : > { %p38_p6 = scmp.ge.s32.totalorder %s2305_s15, 2  ;;  %p182_p7 = scmp.ne.s32.totalorder %s1731_s25, %s1727_s24 }
  0x16   : > { %s1897_s20 = scalar_select %p173_p5, %s1731_s25, %s175_s19  }
  0x17   : > { %s2307_s15 = smov (%p38_p6, %s2305_s15), 0  ;;  %p1903_p8 = por %p182_p7, %p53_p2 }
  0x18   : > { %2278 = sst [smem:[#allocation11_spill]] %s1897_s20  ;;  %p235_p9 = scmp.eq.s32.totalorder %s1381_s14, 7 }
  0x19   : > { %2279 = sst [smem:[#allocation12_spill]] %s2307_s15  ;;  %s40_s22 = ssub.s32 %s1763_s10, %s2307_s15 }
  0x1a   : > { %s45_s23 = sadd.s32 1, %s1739_s27  ;;  %s42_s16 = sor.u32 %s41_s18, %s40_s22 }
  0x1b   : > { %p1913_p10 = por %p235_p9, %p52_p1  ;;  %p43_p11 = scmp.eq.s32.totalorder %s42_s16, 0 }
  0x1c   : > { %p1384_p12 = scmp.ge.s32.totalorder %s1767_s11, 8 }
  0x1d   : > { %s1918_s19 = scalar_select %p43_p11, %s1739_s27, %s45_s23  }
  0x1e   : > { %260 = sbr.rel (%p1384_p12) target bundleno = 63 (0x3f), region = 20 }
  0x23   : > { %263 = sbr.rel (!%p1884_p4) target bundleno = 49 (0x31), region = 24  ;;  %s265_s14 = sand.u32 (%p1884_p4), 1, %s1739_s27  }
  0x24   : > { %s1386_s15 = sshll.u32 (%p1884_p4), %s1763_s10, 3  ;;  %s1385_s18 = sshll.u32 (%p1884_p4), %s265_s14, 5 }
  0x25   : > { %s269_s22 = sadd.s32 (%p1884_p4), %s1759_s9, %s1386_s15  ;;  %s2282_s0 = sld [smem:[#allocation13_spill]] (%p1884_p4) }
  0x26   : > { %s1387_s12 = sshll.u32 (%p1884_p4), %s269_s22, 3  ;;  %s267_s23 = scalar_lea.vmem (%p1884_p4), [#allocation3], %s1385_s18 }
  0x2b   : > { %s271_s16 = scalar_lea.vmem %s2282_s0, %s1387_s12 }
  0x2c   : > { %v306_v0 = vld [vmem:[%s271_s16] sm:$0xff]  ;;  %v308_v1 = vld [vmem:[%s271_s16 + $0x10] sm:$0xff] }
  0x2d   : > { %v310_v2 = vld [vmem:[%s271_s16 + $0x20] sm:$0xff]  ;;  %307 = vst [vmem:[%s267_s23] sm:$0xff] %v306_v0  ;;  %v312_v3 = vld [vmem:[%s271_s16 + $0x30] sm:$0xff] }
  0x2e   : > { %309 = vst [vmem:[%s267_s23 + $0x8] sm:$0xff] %v308_v1 }
  0x2f   : > { %311 = vst [vmem:[%s267_s23 + $0x10] sm:$0xff] %v310_v2 }
  0x30   : > { %313 = vst [vmem:[%s267_s23 + $0x18] sm:$0xff] %v312_v3 }
  0x31 PF: > { %355 = sbr.rel (!%p1903_p8) target bundleno = 63 (0x3f), region = 78  ;;  %s357_s15 = sand.u32 (%p1903_p8), 1, %s1731_s25  }
  0x32   : > { %s1389_s17 = sshll.u32 (%p1903_p8), %s1755_s8, 2  ;;  %s1388_s14 = sshll.u32 (%p1903_p8), %s357_s15, 4 }
  0x33   : > { %s2283_s5 = sld [smem:[#allocation14_spill]] (%p1903_p8)  ;;  %s359_s18 = scalar_lea.vmem (%p1903_p8), [#allocation4], %s1388_s14 }
  0x39   : > { %s361_s20 = scalar_lea.vmem %s2283_s5, %s1389_s17 }
  0x3a   : > { %v378_v4 = vld [vmem:[%s361_s20] sm:$0xf]  ;;  %v380_v5 = vld [vmem:[%s361_s20 + $0x8] sm:$0xf]  ;;  %v382_v6 = vld [vmem:[%s361_s20 + $0x10] sm:$0xf] }
  0x3b   : > { %379 = vst [vmem:[%s359_s18] sm:$0xf] %v378_v4  ;;  %v384_v7 = vld [vmem:[%s361_s20 + $0x18] sm:$0xf] }
  0x3c   : > { %381 = vst [vmem:[%s359_s18 + $0x4] sm:$0xf] %v380_v5 }
  0x3d   : > { %383 = vst [vmem:[%s359_s18 + $0x8] sm:$0xf] %v382_v6 }
  0x3e   : > { %385 = vst [vmem:[%s359_s18 + $0xc] sm:$0xf] %v384_v7 }
  0x3f PF: > { %p1390_p13 = scmp.ge.s32.totalorder %s1767_s11, 1  ;;  %p416_p0 = scmp.lt.s32.totalorder %s1767_s11, 9 }
  0x41   : > { %p417_p1 = pnand %p1390_p13, %p416_p0 }
  0x42   : > { %s423_s21 = sand.u32 (!%p417_p1), 1, %s1735_s26   ;;  %s430_s22 = sand.u32 (!%p417_p1), 1, %s1727_s24  }
  0x43   : > { %420 = sbr.rel (%p417_p1) target bundleno = 638 (0x27e), region = 119  ;;  %s1391_s16 = sshll.u32 (!%p417_p1), %s423_s21, 5 }
  0x44   : > { %s1940_s23 = sshll.u32 (!%p417_p1), %s430_s22, 4  ;;  %s1394_s15 = sshll.u32 (!%p417_p1), %s1743_s28, 4 }
  0x45   : > { %p485_p2 = scmp.lt.s32.totalorder (!%p417_p1), %s1394_s15, 31  ;;  %s432_s8 = scalar_lea.vmem (!%p417_p1), [#allocation4], %s1940_s23 }
  0x46   : > { %s1964_s7 = scalar_lea.vmem (!%p417_p1), [#allocation5], %s1391_s16  ;;  %p1402_p3 = scmp.ne.s32.totalorder (!%p417_p1), %s1743_s28, 0 }
  0x48   : > { %s2309_s15 = smov (!%p485_p2, %s1394_s15), 31  ;;  %512 = sbr.rel (%p1402_p3) target bundleno = 82 (0x52), region = 131 }
  0x49   : > { %s1395_s17 = sshll.u32 %s2309_s15, 2  ;;  %s1397_s14 = sshll.u32 %s2309_s15, 3 }
  0x4a   : > { %s1946_s20 = scalar_lea.vmem %s2256_s1, %s1395_s17  ;;  %s1951_s5 = scalar_lea.vmem %s2257_s2, %s1397_s14 }
  0x4b   : > { %s1956_s21 = scalar_lea.vmem %s2258_s3, %s1395_s17  ;;  %s1961_s9 = scalar_lea.vmem %s2259_s4, %s1397_s14 }
  0x4c   : > { %s425_s15 = scalar_lea.vmem [#allocation3], %s1391_s16 }
  0x4d   : > { %v1769_v8 = vmov 0.0  }
  0x4e   : > { %513 = vst [vmem:[#allocation2 + $0x10] sm:$0xff] %v1769_v8 }
  0x4f   : > { %514 = vst [vmem:[#allocation2] sm:$0xff] %v1769_v8 }
  0x50   : > { %515 = vst [vmem:[#allocation2 + $0x18] sm:$0xff] %v1769_v8 }
  0x51   : > { %516 = vst [vmem:[#allocation2 + $0x8] sm:$0xff] %v1769_v8 }
  0x52 PF: > { %v553_v9 = vld [vmem:[%s1951_s5 + $0x70] sm:$0xff]  ;;  %v551_v10 = vld [vmem:[%s1951_s5 + $0x60] sm:$0xff]  ;;  %v1770_v12 = vmov 0   ;;  %v520_v13 = vld [vmem:[%s425_s15 + $0x18] sm:$0xff]  ;;  %vm675_vm0 = vcmask 261120   ;;  %p1491_p4 = scmp.ne.s32.totalorder %s1743_s28, 1 }
  0x53   : > { %v519_v11 = vld [vmem:[%s425_s15 + $0x10] sm:$0xff]  ;;  %1613 = vset.pattern.permute.xlu1 %v1770_v12  ;;  %1612 = vset.pattern.permute.xlu0 %v1770_v12  ;;  %v517_v14 = vld [vmem:[%s425_s15] sm:$0xff]  ;;  %v518_v16 = vld [vmem:[%s425_s15 + $0x8] sm:$0xff] }
  0x54   : > { %627 = vperm.xlu0 %1612, %v553_v9   ;;  %617 = vperm.xlu1 %1613, %v551_v10   ;;  %v522_v15 = vpack.c.bf16 %v520_v13, %v519_v11  ;;  %v549_v17 = vld [vmem:[%s1951_s5 + $0x50] sm:$0xff]  ;;  %v521_v18 = vpack.c.bf16 %v518_v16, %v517_v14  ;;  %v554_v19 = vld [vmem:[%s1951_s5 + $0x78] sm:$0xff]  ;;  %v552_v20 = vld [vmem:[%s1951_s5 + $0x68] sm:$0xff] }
  0x55   : > { %1614 = vset.pattern.permute.xlu2 %v1770_v12  ;;  %v1497_v21 = vld [vmem:[%s1946_s20] sm:$0xff]  ;;  %v1502_v22 = vld [vmem:[%s1946_s20 + $0x28] sm:$0xff]  ;;  %v1504_v23 = vld [vmem:[%s1946_s20 + $0x38] sm:$0xff] }
  0x56   : > { %706 = vmatpush.bf16.msra.mxu0 %v522_v15  ;;  %1515 = vmatpush.bf16.msra.mxu2 %v522_v15  ;;  %v1505_v24 = vld [vmem:[%s1956_s21] sm:$0xff]  ;;  %v550_v25 = vld [vmem:[%s1951_s5 + $0x58] sm:$0xff]  ;;  %v548_v26 = vld [vmem:[%s1951_s5 + $0x48] sm:$0xff] }
  0x57   : > { %1516 = vmatpush.bf16.msra.mxu3 %v522_v15  ;;  %931 = vmatpush.bf16.msra.mxu1 %v522_v15  ;;  %v547_v27 = vld [vmem:[%s1951_s5 + $0x40] sm:$0xff]  ;;  %v545_v28 = vld [vmem:[%s1951_s5 + $0x30] sm:$0xff]  ;;  %v546_v29 = vld [vmem:[%s1951_s5 + $0x38] sm:$0xff] }
  0x58   : > { %607 = vperm.xlu2 %1614, %v549_v17   ;;  %v543_v30 = vld [vmem:[%s1951_s5 + $0x20] sm:$0xff]  ;;  %v1498_v31 = vld [vmem:[%s1946_s20 + $0x8] sm:$0xff]  ;;  %v1503_v32 = vld [vmem:[%s1946_s20 + $0x30] sm:$0xff] }
  0x59   : > { %v1506_v33 = vld [vmem:[%s1956_s21 + $0x8] sm:$0xff]  ;;  %v779_v36 = vld [vmem:[%s1961_s9 + $0x70] sm:$0xff]  ;;  %v780_v37 = vld [vmem:[%s1961_s9 + $0x78] sm:$0xff] }
  0x5a   : > { %707 = vmatpush.bf16.msra.mxu0 %v521_v18  ;;  %1517 = vmatpush.bf16.msra.mxu2 %v521_v18  ;;  %v1510_v34 = vld [vmem:[%s1956_s21 + $0x28] sm:$0xff]  ;;  %v541_v38 = vld [vmem:[%s1951_s5 + $0x10] sm:$0xff]  ;;  %v777_v39 = vld [vmem:[%s1961_s9 + $0x60] sm:$0xff] }
  0x5b   : > { %1518 = vmatpush.bf16.msra.mxu3 %v521_v18  ;;  %932 = vmatpush.bf16.msra.mxu1 %v521_v18  ;;  %v544_v35 = vld [vmem:[%s1951_s5 + $0x28] sm:$0xff]  ;;  %v542_v40 = vld [vmem:[%s1951_s5 + $0x18] sm:$0xff]  ;;  %v1499_v41 = vld [vmem:[%s1946_s20 + $0x10] sm:$0xff] }
  0x5c   : > { %632 = vperm.xlu0 %1612, %v554_v19   ;;  %622 = vperm.xlu1 %1613, %v552_v20   ;;  %v1507_v42 = vld [vmem:[%s1956_s21 + $0x10] sm:$0xff]  ;;  %v778_v44 = vld [vmem:[%s1961_s9 + $0x68] sm:$0xff]  ;;  %v539_v46 = vld [vmem:[%s1951_s5] sm:$0xff] }
  0x5d   : > { %1435 = vmatmul.msk.bf16.vlgmr.msra.gmra.mxu0 %vm675_vm0, %v1497_v21  ;;  %1440 = vmatmul.msk.bf16.vlgmr.msra.gmra.mxu2 %vm675_vm0, %v1502_v22  ;;  %v1511_v43 = vld [vmem:[%s1956_s21 + $0x30] sm:$0xff]  ;;  %v540_v45 = vld [vmem:[%s1951_s5 + $0x8] sm:$0xff]  ;;  %v773_v48 = vld [vmem:[%s1961_s9 + $0x40] sm:$0xff] }
  0x5e   : > { %1442 = vmatmul.msk.bf16.vlgmr.msra.gmra.mxu3 %vm675_vm0, %v1504_v23  ;;  %1475 = vmatmul.msk.bf16.vlgmr.msra.gmra.mxu1 %vm675_vm0, %v1505_v24  ;;  %v775_v47 = vld [vmem:[%s1961_s9 + $0x50] sm:$0xff]  ;;  %v776_v49 = vld [vmem:[%s1961_s9 + $0x58] sm:$0xff]  ;;  %v774_v53 = vld [vmem:[%s1961_s9 + $0x48] sm:$0xff] }
  0x5f   : > { %1519 = vmatpush.bf16.msrb.mxu3 %v522_v15  ;;  %v1500_v50 = vld [vmem:[%s1946_s20 + $0x18] sm:$0xff]  ;;  %v771_v55 = vld [vmem:[%s1961_s9 + $0x30] sm:$0xff]  ;;  %v769_v56 = vld [vmem:[%s1961_s9 + $0x20] sm:$0xff] }
  0x60   : > { %612 = vperm.xlu2 %1614, %v550_v25   ;;  %v1508_v51 = vld [vmem:[%s1956_s21 + $0x18] sm:$0xff]  ;;  %v767_v57 = vld [vmem:[%s1961_s9 + $0x10] sm:$0xff]  ;;  %v770_v58 = vld [vmem:[%s1961_s9 + $0x28] sm:$0xff] }
  0x61   : > { %v1512_v52 = vld [vmem:[%s1956_s21 + $0x38] sm:$0xff]  ;;  %v1501_v59 = vld [vmem:[%s1946_s20 + $0x20] sm:$0xff]  ;;  %v766_v62 = vld [vmem:[%s1961_s9 + $0x8] sm:$0xff] }
  0x62   : > { %v772_v54 = vld [vmem:[%s1961_s9 + $0x38] sm:$0xff]  ;;  %v1509_v60 = vld [vmem:[%s1956_s21 + $0x20] sm:$0xff] }
  0x63   : > { %1520 = vmatpush.bf16.msrb.mxu3 %v521_v18  ;;  %v768_v61 = vld [vmem:[%s1961_s9 + $0x18] sm:$0xff]  ;;  %v765_v63 = vld [vmem:[%s1961_s9] sm:$0xff] }
  0x64   : > { %602 = vperm.xlu1 %1613, %v548_v26   ;;  %597 = vperm.xlu0 %1612, %v547_v27  }
  0x68   : > { %587 = vperm.xlu2 %1614, %v545_v28  }
  0x6c   : > { %592 = vperm.xlu0 %1612, %v546_v29   ;;  %577 = vperm.xlu1 %1613, %v543_v30  }
  0x6d   : > { %1436 = vmatmul.msk.bf16.gmra.mxu0 %vm675_vm0, %v1498_v31  ;;  %1441 = vmatmul.msk.bf16.gmra.mxu2 %vm675_vm0, %v1503_v32 }
  0x6e   : > { %1476 = vmatmul.msk.bf16.gmra.mxu1 %vm675_vm0, %v1506_v33  ;;  %1480 = vmatmul.msk.bf16.vlgmr.msrb.gmra.mxu3 %vm675_vm0, %v1510_v34 }
  0x70   : > { %582 = vperm.xlu2 %1614, %v544_v35  }
  0x74   : > { %853 = vperm.xlu0 %1612, %v779_v36   ;;  %858 = vperm.xlu1 %1613, %v780_v37  }
  0x78   : > { %567 = vperm.xlu2 %1614, %v541_v38  }
  0x7c   : > { %843 = vperm.xlu1 %1613, %v777_v39   ;;  %572 = vperm.xlu0 %1612, %v542_v40  }
  0x7d   : > { %1437 = vmatmul.msk.bf16.gmra.mxu0 %vm675_vm0, %v1499_v41 }
  0x7e   : > { %1477 = vmatmul.msk.bf16.gmra.mxu1 %vm675_vm0, %v1507_v42  ;;  %1481 = vmatmul.msk.bf16.gmra.mxu3 %vm675_vm0, %v1511_v43 }
  0x80   : > { %848 = vperm.xlu2 %1614, %v778_v44  }
  0x84   : > { %562 = vperm.xlu1 %1613, %v540_v45   ;;  %557 = vperm.xlu0 %1612, %v539_v46  }
  0x88   : > { %833 = vperm.xlu2 %1614, %v775_v47  }
  0x8c   : > { %823 = vperm.xlu1 %1613, %v773_v48   ;;  %838 = vperm.xlu0 %1612, %v776_v49  }
  0x8d   : > { %1438 = vmatmul.msk.bf16.gmra.mxu0 %vm675_vm0, %v1500_v50 }
  0x8e   : > { %1478 = vmatmul.msk.bf16.gmra.mxu1 %vm675_vm0, %v1508_v51  ;;  %1482 = vmatmul.msk.bf16.gmra.mxu3 %vm675_vm0, %v1512_v52 }
  0x90   : > { %828 = vperm.xlu2 %1614, %v774_v53  }
  0x94   : > { %818 = vperm.xlu1 %1613, %v772_v54   ;;  %813 = vperm.xlu0 %1612, %v771_v55  }
  0x98   : > { %803 = vperm.xlu2 %1614, %v769_v56  }
  0x9c   : > { %793 = vperm.xlu1 %1613, %v767_v57   ;;  %808 = vperm.xlu0 %1612, %v770_v58  }
  0x9d   : > { %1439 = vmatmul.msk.bf16.gmra.mxu0 %vm675_vm0, %v1501_v59 }
  0x9e   : > { %1479 = vmatmul.msk.bf16.gmra.mxu1 %vm675_vm0, %v1509_v60 }
  0xa0   : > { %798 = vperm.xlu2 %1614, %v768_v61  }
  0xa4   : > { %788 = vperm.xlu1 %1613, %v766_v62   ;;  %783 = vperm.xlu0 %1612, %v765_v63  }
  0xb2   : > { %v608_v0 = vpop.permute.xlu2 %607 }
  0xba   : > { %v613_v3 = vpop.permute.xlu2 %612 }
  0xc2   : > { %v2035_v8 = vpop.permute.xlu2 %587 }
  0xc6   : > { %v628_v1 = vpop.permute.xlu0 %627  ;;  %v618_v2 = vpop.permute.xlu1 %617 }
  0xca   : > { %v2043_v15 = vpop.permute.xlu2 %582 }
  0xce   : > { %v633_v4 = vpop.permute.xlu0 %632  ;;  %v623_v5 = vpop.permute.xlu1 %622 }
  0xd2   : > { %v568_v23 = vpop.permute.xlu2 %567 }
  0xd6   : > { %v2031_v6 = vpop.permute.xlu1 %602  ;;  %v2033_v7 = vpop.permute.xlu0 %597 }
  0xda   : > { %v709_v9 = vpop.f32.mrf.mxu0 }
  0xdb   : > { %v2037_v10 = vpop.f32.mrf.mxu1 }
  0xde   : > { %v2039_v11 = vpop.permute.xlu0 %592  ;;  %v2041_v12 = vpop.permute.xlu1 %577 }
  0xe0   : > { %v734_v13 = vpop.f32.mrf.mxu2 }
  0xe1   : > { %v744_v14 = vpop.f32.mrf.mxu3  ;;  %v2089_v52 = vadd.f32 %v734_v13, %v608_v0 }
  0xe2   : > { %v711_v16 = vpop.f32.mrf.mxu0  ;;  %v2064_v33 = vadd.f32 %v744_v14, %v628_v1 }
  0xe3   : > { %v2045_v17 = vpop.f32.mrf.mxu1  ;;  %v984_v62 = vsub.f32 0.0, %v2089_v52 }
  0xe4   : > { %v988_v44 = vsub.f32 0.0, %v2064_v33 }
  0xe6   : > { %v2047_v18 = vpop.permute.xlu0 %853  ;;  %v2049_v19 = vpop.permute.xlu1 %858  ;;  %v1018_v55 = vmul.f32 1.442695, %v988_v44 }
  0xe8   : > { %v736_v20 = vpop.f32.mrf.mxu2 }
  0xe9   : > { %v746_v21 = vpop.f32.mrf.mxu3  ;;  %v2085_v48 = vadd.f32 %v736_v20, %v613_v3 }
  0xea   : > { %v714_v22 = vpop.f32.mrf.mxu0  ;;  %v2066_v36 = vadd.f32 %v746_v21, %v633_v4 }
  0xeb   : > { %v2051_v24 = vadd.f32 %v714_v22, %v568_v23  ;;  %v2057_v27 = vpop.f32.mrf.mxu1  ;;  %v985_v59 = vsub.f32 0.0, %v2085_v48 }
  0xec   : > { %v989_v49 = vsub.f32 0.0, %v2066_v36 }
  0xed   : > { %v976_v29 = vsub.f32 0.0, %v2051_v24  ;;  %v1012_v3 = vmul.f32 1.442695, %v985_v59 }
  0xee   : > { %v2053_v25 = vpop.permute.xlu1 %843  ;;  %v2055_v26 = vpop.permute.xlu0 %572  ;;  %v1020_v60 = vmul.f32 1.442695, %v989_v49 }
  0xef   : > { %v994_v32 = vmul.f32 1.442695, %v976_v29 }
  0xf0   : > { %v739_v28 = vpop.f32.mrf.mxu2 }
  0xf1   : > { %v2060_v30 = vpop.f32.mrf.mxu3  ;;  %1615 = vpow2.f32 %v994_v32  ;;  %v2072_v40 = vadd.f32 %v739_v28, %v618_v2 }
  0xf2   : > { %v2062_v31 = vpop.f32.mrf.mxu0 }
  0xf3   : > { %v2074_v41 = vpop.f32.mrf.mxu1  ;;  %v986_v53 = vsub.f32 0.0, %v2072_v40 }
  0xf5   : > { %v1014_v63 = vmul.f32 1.442695, %v986_v53 }
  0xf6   : > { %v563_v34 = vpop.permute.xlu1 %562  ;;  %v558_v35 = vpop.permute.xlu0 %557 }
  0xf7   : > { %v2068_v37 = vadd.f32 %v711_v16, %v563_v34  ;;  %v2070_v38 = vadd.f32 %v709_v9, %v558_v35  ;;  %v1616_v58 = vpop.eup %1615 }
  0xf8   : > { %v741_v39 = vpop.f32.mrf.mxu2  ;;  %v1024_v1 = vadd.f32 1.0, %v1616_v58 }
  0xf9   : > { %v975_v42 = vsub.f32 0.0, %v2068_v37  ;;  %v2077_v43 = vpop.f32.mrf.mxu3  ;;  %v974_v45 = vsub.f32 0.0, %v2070_v38  ;;  %v2081_v46 = vadd.f32 %v741_v39, %v623_v5  ;;  %v1010_v5 = vmul.f32 1.442695, %v984_v62 }
  0xfa   : > { %v2083_v47 = vpop.f32.mrf.mxu0 }
  0xfb   : > { %v992_v50 = vmul.f32 1.442695, %v975_v42  ;;  %v987_v51 = vsub.f32 0.0, %v2081_v46  ;;  %v990_v54 = vmul.f32 1.442695, %v974_v45  ;;  %v2102_v4 = vpop.f32.mrf.mxu1 }
  0xfd   : > { %1617 = vpow2.f32 %v992_v50  ;;  %v1016_v61 = vmul.f32 1.442695, %v987_v51 }
  0xfe   : > { %v2092_v56 = vpop.permute.xlu1 %823  ;;  %v2094_v57 = vpop.permute.xlu0 %838  ;;  %1619 = vpow2.f32 %v990_v54 }
  0xff   : > { %1621 = vpow2.f32 %v1018_v55 }
 0x100   : > { %1623 = vpow2.f32 %v1020_v60 }
 0x101   : > { %v2098_v0 = vpop.f32.mrf.mxu3  ;;  %1625 = vpow2.f32 %v1016_v61 }
 0x102   : > { %v2100_v2 = vpop.f32.mrf.mxu0  ;;  %1627 = vpow2.f32 %v1014_v63 }
 0x103   : > { %v1618_v9 = vpop.eup %1617  ;;  %1629 = vrcp.f32 %v1024_v1  ;;  %v2110_v49 = vpop.f32.mrf.mxu1 }
 0x104   : > { %v1620_v16 = vpop.eup %1619  ;;  %1631 = vpow2.f32 %v1012_v3  ;;  %v1023_v22 = vadd.f32 1.0, %v1618_v9 }
 0x105   : > { %v1622_v20 = vpop.eup %1621  ;;  %1633 = vpow2.f32 %v1010_v5  ;;  %v1022_v29 = vadd.f32 1.0, %v1620_v16  ;;  %v849_v5 = vpop.permute.xlu2 %848 }
 0x106   : > { %v2104_v13 = vpop.permute.xlu1 %818  ;;  %v2106_v14 = vpop.permute.xlu0 %813  ;;  %v1036_v35 = vadd.f32 1.0, %v1622_v20  ;;  %1635 = vrcp.f32 %v1023_v22 }
 0x107   : > { %v1624_v21 = vpop.eup %1623  ;;  %1637 = vrcp.f32 %v1022_v29 }
 0x108   : > { %v1626_v28 = vpop.eup %1625  ;;  %v1037_v42 = vadd.f32 1.0, %v1624_v21  ;;  %1639 = vrcp.f32 %v1036_v35 }
 0x109   : > { %v2108_v23 = vpop.f32.mrf.mxu3  ;;  %v1628_v34 = vpop.eup %1627  ;;  %v1035_v45 = vadd.f32 1.0, %v1626_v28 }
 0x10a   : > { %v724_v32 = vpop.f32.mrf.mxu0  ;;  %v1630_v39 = vpop.eup %1629  ;;  %v1034_v50 = vadd.f32 1.0, %v1628_v34  ;;  %1641 = vrcp.f32 %v1037_v42 }
 0x10b   : > { %v1632_v44 = vpop.eup %1631  ;;  %v1056_v55 = vmul.f32 %v1630_v39, %v2051_v24  ;;  %1643 = vrcp.f32 %v1035_v45  ;;  %v2126_v39 = vadd.f32 %v724_v32, %v2035_v8  ;;  %v2128_v42 = vpop.f32.mrf.mxu1  ;;  %v2144_v32 = vadd.f32 %v2100_v2, %v2043_v15 }
 0x10c   : > { %v1634_v54 = vpop.eup %1633  ;;  %v1033_v59 = vadd.f32 1.0, %v1632_v44  ;;  %1645 = vrcp.f32 %v1034_v50 }
 0x10d   : > { %v1032_v62 = vadd.f32 1.0, %v1634_v54  ;;  %v1636_v1 = vpop.eup %1635 }
 0x10e   : > { %v794_v51 = vpop.permute.xlu1 %793  ;;  %v2112_v53 = vpop.permute.xlu0 %808  ;;  %1647 = vrcp.f32 %v1033_v59  ;;  %v1055_v24 = vmul.f32 %v1636_v1, %v2068_v37  ;;  %v962_v59 = vadd.f32 %v2077_v43, %v2094_v57  ;;  %v2168_v43 = vadd.f32 %v2062_v31, %v2055_v26 }
 0x10f   : > { %v940_v58 = vadd.f32 %v2057_v27, %v794_v51  ;;  %v1638_v3 = vpop.eup %1637  ;;  %1649 = vrcp.f32 %v1032_v62 }
 0x110   : > { %v1640_v9 = vpop.eup %1639  ;;  %v1054_v22 = vmul.f32 %v1638_v3, %v2070_v38  ;;  %v2134_v38 = vadd.f32 %v2083_v47, %v2041_v12 }
 0x111   : > { %v2116_v60 = vmul.f32 %v1056_v55, %v940_v58  ;;  %v969_v61 = vpop.f32.mrf.mxu3  ;;  %v1642_v16 = vpop.eup %1641  ;;  %v1068_v44 = vmul.f32 %v1640_v9, %v2064_v33  ;;  %v980_v55 = vsub.f32 0.0, %v2126_v39 }
 0x112   : > { %v726_v63 = vpop.f32.mrf.mxu0  ;;  %v1644_v21 = vpop.eup %1643  ;;  %v970_v37 = vadd.f32 %v969_v61, %v2047_v18  ;;  %v1069_v50 = vmul.f32 %v1642_v16, %v2066_v36 }
 0x113   : > { %v2121_v28 = vadd.f32 %v726_v63, %v2039_v11  ;;  %v1646_v35 = vpop.eup %1645  ;;  %v1067_v8 = vmul.f32 %v1644_v21, %v2081_v46  ;;  %v967_v46 = vadd.f32 %v2108_v23, %v849_v5  ;;  %v979_v23 = vsub.f32 0.0, %v2144_v32  ;;  %v951_v57 = vpop.f32.mrf.mxu1 }
 0x114   : > { %v1066_v12 = vmul.f32 %v1646_v35, %v2072_v40  ;;  %v1084_v15 = vmul.f32 %v1068_v44, %v970_v37  ;;  %v834_v40 = vpop.permute.xlu2 %833  ;;  %v1002_v16 = vmul.f32 1.442695, %v980_v55  ;;  %v977_v21 = vsub.f32 0.0, %v2168_v43 }
 0x115   : > { %v981_v47 = vsub.f32 0.0, %v2121_v28  ;;  %v1083_v61 = vmul.f32 %v1067_v8, %v967_v46  ;;  %v960_v63 = vadd.f32 %v2060_v30, %v834_v40 }
 0x116   : > { %v789_v20 = vpop.permute.xlu1 %788  ;;  %v784_v27 = vpop.permute.xlu0 %783  ;;  %v996_v35 = vmul.f32 1.442695, %v977_v21 }
 0x117   : > { %v937_v29 = vadd.f32 %v2045_v17, %v789_v20  ;;  %v935_v34 = vadd.f32 %v2037_v10, %v784_v27  ;;  %v1648_v10 = vpop.eup %1647  ;;  %v1004_v1 = vmul.f32 1.442695, %v981_v47 }
 0x118   : > { %v1650_v36 = vpop.eup %1649 }
 0x119   : > { %v2136_v11 = vmul.f32 %v1055_v24, %v937_v29  ;;  %v2138_v45 = vmul.f32 %v1054_v22, %v935_v34  ;;  %v971_v17 = vpop.f32.mrf.mxu3  ;;  %v1064_v5 = vmul.f32 %v1650_v36, %v2089_v52  ;;  %v1000_v24 = vmul.f32 1.442695, %v979_v23 }
 0x11a   : > { %v972_v18 = vadd.f32 %v971_v17, %v2049_v19  ;;  %v729_v33 = vpop.f32.mrf.mxu0  ;;  %v1065_v19 = vmul.f32 %v1648_v10, %v2085_v48  ;;  %v978_v48 = vsub.f32 0.0, %v2134_v38 }
 0x11b   : > { %v2150_v51 = vadd.f32 %v729_v33, %v2033_v7  ;;  %v1094_v54 = vpack.c.bf16 %v2136_v11, %v2138_v45  ;;  %v965_v7 = vadd.f32 %v2098_v0, %v2053_v25  ;;  %v1080_v27 = vmul.f32 %v1064_v5, %v960_v63 }
 0x11c   : > { %v1085_v2 = vmul.f32 %v1069_v50, %v972_v18  ;;  %v1081_v25 = vmul.f32 %v1065_v19, %v962_v59  ;;  %v998_v52 = vmul.f32 1.442695, %v978_v48  ;;  %v829_v18 = vpop.permute.xlu2 %828  ;;  %v952_v5 = vadd.f32 %v951_v57, %v2104_v13 }
 0x11d   : > { %v982_v58 = vsub.f32 0.0, %v2150_v51  ;;  %v1082_v9 = vmul.f32 %v1066_v12, %v965_v7 }
 0x11e   : > { %v1101_v62 = vpack.c.bf16 %v1085_v2, %v1084_v15  ;;  %v1099_v29 = vpack.c.bf16 %v1081_v25, %v1080_v27 }
 0x11f   : > { %v1006_v3 = vmul.f32 1.442695, %v982_v58  ;;  %v1100_v30 = vpack.c.bf16 %v1083_v61, %v1082_v9 }
 0x120   : > { %1114 = vmatpush.bf16.msrb.mxu2 %v1101_v62 }
 0x121   : > { %1651 = vpow2.f32 %v1006_v3 }
 0x122   : > { %v731_v0 = vpop.f32.mrf.mxu0  ;;  %1653 = vpow2.f32 %v1004_v1 }
 0x123   : > { %v732_v20 = vadd.f32 %v731_v0, %v2031_v6  ;;  %1655 = vpow2.f32 %v1002_v16  ;;  %v954_v6 = vpop.f32.mrf.mxu1 }
 0x124   : > { %1115 = vmatpush.bf16.msrb.mxu2 %v1100_v30  ;;  %1657 = vpow2.f32 %v1000_v24  ;;  %v804_v7 = vpop.permute.xlu2 %803  ;;  %v955_v62 = vadd.f32 %v954_v6, %v2092_v56  ;;  %v947_v24 = vadd.f32 %v2110_v49, %v2112_v53  ;;  %v1513_v53 = vld [vmem:[%s432_s8] sm:$0xff] }
 0x125   : > { %v983_v22 = vsub.f32 0.0, %v732_v20  ;;  %1659 = vpow2.f32 %v998_v52  ;;  %v945_v13 = vadd.f32 %v2102_v4, %v804_v7  ;;  %v1514_v4 = vld [vmem:[%s432_s8 + $0x8] sm:$0xff] }
 0x127   : > { %v1652_v34 = vpop.eup %1651  ;;  %v1008_v26 = vmul.f32 1.442695, %v983_v22 }
 0x128   : > { %1116 = vmatpush.bf16.msrb.mxu2 %v1099_v29  ;;  %v1654_v31 = vpop.eup %1653  ;;  %v1030_v44 = vadd.f32 1.0, %v1652_v34 }
 0x129   : > { %1661 = vpow2.f32 %v1008_v26  ;;  %v1656_v37 = vpop.eup %1655  ;;  %v1029_v17 = vadd.f32 1.0, %v1654_v31 }
 0x12a   : > { %v1658_v10 = vpop.eup %1657  ;;  %1663 = vpow2.f32 %v996_v35  ;;  %v1028_v50 = vadd.f32 1.0, %v1656_v37  ;;  %v1089_v35 = vld [vmem:[#allocation2 + $0x8] sm:$0xff] }
 0x12b   : > { %v1660_v8 = vpop.eup %1659  ;;  %1665 = vrcp.f32 %v1030_v44  ;;  %v1027_v12 = vadd.f32 1.0, %v1658_v10  ;;  %v956_v19 = vpop.f32.mrf.mxu1 }
 0x12c   : > { %1667 = vrcp.f32 %v1029_v17  ;;  %v1026_v36 = vadd.f32 1.0, %v1660_v8  ;;  %v957_v23 = vadd.f32 %v956_v19, %v829_v18 }
 0x12d   : > { %1669 = vrcp.f32 %v1028_v50 }
 0x12f   : > { %v1662_v33 = vpop.eup %1661 }
 0x130   : > { %v1031_v47 = vadd.f32 1.0, %v1662_v33  ;;  %v1664_v46 = vpop.eup %1663 }
 0x131   : > { %v1666_v55 = vpop.eup %1665  ;;  %v1025_v2 = vadd.f32 1.0, %v1664_v46 }
 0x132   : > { %1671 = vrcp.f32 %v1031_v47  ;;  %v1668_v15 = vpop.eup %1667  ;;  %v1062_v40 = vmul.f32 %v1666_v55, %v2150_v51  ;;  %v950_v51 = vadd.f32 %v2128_v42, %v2106_v14 }
 0x133   : > { %1673 = vrcp.f32 %v1027_v12  ;;  %v1670_v58 = vpop.eup %1669  ;;  %v1061_v61 = vmul.f32 %v1668_v15, %v2121_v28 }
 0x134   : > { %1675 = vrcp.f32 %v1026_v36  ;;  %v1060_v3 = vmul.f32 %v1670_v58, %v2126_v39  ;;  %v1078_v48 = vmul.f32 %v1062_v40, %v955_v62 }
 0x135   : > { %1677 = vrcp.f32 %v1025_v2  ;;  %v1077_v0 = vmul.f32 %v1061_v61, %v952_v5 }
 0x136   : > { %v1076_v30 = vmul.f32 %v1060_v3, %v950_v51 }
 0x138   : > { %v1672_v59 = vpop.eup %1671 }
 0x139   : > { %v1063_v63 = vmul.f32 %v1672_v59, %v732_v20  ;;  %v1674_v1 = vpop.eup %1673  ;;  %v1097_v20 = vpack.c.bf16 %v1077_v0, %v1076_v30 }
 0x13a   : > { %v1676_v16 = vpop.eup %1675  ;;  %v1059_v25 = vmul.f32 %v1674_v1, %v2144_v32  ;;  %v799_v32 = vpop.permute.xlu2 %798 }
 0x13b   : > { %v1079_v9 = vmul.f32 %v1063_v63, %v957_v23  ;;  %v1058_v56 = vmul.f32 %v1676_v16, %v2134_v38  ;;  %v1678_v39 = vpop.eup %1677  ;;  %v942_v42 = vadd.f32 %v2074_v41, %v799_v32  ;;  %v1087_v41 = vld [vmem:[#allocation2] sm:$0xff] }
 0x13c   : > { %v1075_v57 = vmul.f32 %v1059_v25, %v947_v24  ;;  %v1057_v27 = vmul.f32 %v1678_v39, %v2168_v43  ;;  %v1086_v43 = vld [vmem:[#allocation2 + $0x10] sm:$0xff] }
 0x13d   : > { %v1098_v28 = vpack.c.bf16 %v1079_v9, %v1078_v48  ;;  %v1074_v14 = vmul.f32 %v1058_v56, %v945_v13 }
 0x13e   : > { %v1073_v52 = vmul.f32 %v1057_v27, %v942_v42 }
 0x13f   : > { %1117 = vmatpush.bf16.msrb.mxu2 %v1098_v28  ;;  %v1096_v38 = vpack.c.bf16 %v1075_v57, %v1074_v14 }
 0x140   : > { %v1095_v49 = vpack.c.bf16 %v1073_v52, %v2116_v60  ;;  %v1088_v60 = vld [vmem:[#allocation2 + $0x18] sm:$0xff] }
 0x143   : > { %1118 = vmatpush.bf16.msrb.mxu2 %v1097_v20 }
 0x147   : > { %1119 = vmatpush.bf16.msrb.mxu2 %v1096_v38 }
 0x14b   : > { %1120 = vmatpush.bf16.msrb.mxu2 %v1095_v49 }
 0x14f   : > { %1121 = vmatpush.bf16.msrb.mxu2 %v1094_v54 }
 0x152   : > { %1122 = vmatmul.bf16.vlgmr.msrb.gmra.mxu2 %v1513_v53 }
 0x162   : > { %1127 = vmatmul.bf16.gmra.mxu2 %v1514_v4 }
 0x1d5   : > { %v1123_v21 = vpop.f32.mrf.mxu2 }
 0x1d6   : > { %v1133_v22 = vadd.f32 %v1123_v21, %v1086_v43 }
 0x1d8   : > { %1137 = vst [vmem:[#allocation2 + $0x10] sm:$0xff] %v1133_v22 }
 0x1dd   : > { %v1125_v29 = vpop.f32.mrf.mxu2 }
 0x1de   : > { %v1134_v34 = vadd.f32 %v1125_v29, %v1087_v41 }
 0x1e0   : > { %1138 = vst [vmem:[#allocation2] sm:$0xff] %v1134_v34 }
 0x1e5   : > { %v1128_v26 = vpop.f32.mrf.mxu2 }
 0x1e6   : > { %v1135_v31 = vadd.f32 %v1128_v26, %v1088_v60 }
 0x1e8   : > { %1139 = vst [vmem:[#allocation2 + $0x18] sm:$0xff] %v1135_v31 }
 0x1ec   : > { %1144 = sbr.rel (%p1491_p4) target bundleno = 626 (0x272), region = 135 }
 0x1ed   : > { %v1130_v37 = vpop.f32.mrf.mxu2 }
 0x1ee   : > { %v1136_v11 = vadd.f32 %v1130_v37, %v1089_v35 }
 0x1f0   : > { %1140 = vst [vmem:[#allocation2 + $0x8] sm:$0xff] %v1136_v11 }
 0x1f1   : > { %v1151_v45 = vld [vmem:[%s2261_s6 + $0x10] sm:$0xff]  ;;  %v1149_v54 = vld [vmem:[%s2261_s6] sm:$0xff]  ;;  %v1771_v44 = vmov 0   ;;  %v1152_v17 = vld [vmem:[%s2261_s6 + $0x18] sm:$0xff] }
 0x1f2   : > { %1680 = vset.pattern.permute.xlu1 %v1771_v44  ;;  %1679 = vset.pattern.permute.xlu0 %v1771_v44  ;;  %v1150_v6 = vld [vmem:[%s2261_s6 + $0x8] sm:$0xff]  ;;  %v1147_v10 = vld [vmem:[#allocation2 + $0x18] sm:$0xff]  ;;  %v1145_v50 = vld [vmem:[#allocation2 + $0x10] sm:$0xff] }
 0x1f3   : > { %1165 = vperm.xlu1 %1680, %v1151_v45   ;;  %1155 = vperm.xlu0 %1679, %v1149_v54   ;;  %v1146_v36 = vld [vmem:[#allocation2] sm:$0xff] }
 0x1f7   : > { %v1148_v47 = vld [vmem:[#allocation2 + $0x8] sm:$0xff] }
 0x1fb   : > { %1170 = vperm.xlu1 %1680, %v1152_v17   ;;  %1160 = vperm.xlu0 %1679, %v1150_v6  }
 0x265   : > { %v1166_v8 = vpop.permute.xlu1 %1165  ;;  %v1156_v18 = vpop.permute.xlu0 %1155 }
 0x266   : > { %v1175_v33 = vadd.f32 %v1166_v8, %v1147_v10  ;;  %v1173_v12 = vadd.f32 %v1156_v18, %v1145_v50 }
 0x268   : > { %1179 = vst [vmem:[%s1964_s7 + $0x10] sm:$0xff] %v1175_v33 }
 0x269   : > { %1177 = vst [vmem:[%s1964_s7] sm:$0xff] %v1173_v12 }
 0x26d   : > { %v1171_v46 = vpop.permute.xlu1 %1170  ;;  %v1161_v55 = vpop.permute.xlu0 %1160 }
 0x26e   : > { %v1176_v15 = vadd.f32 %v1171_v46, %v1148_v47  ;;  %v1174_v2 = vadd.f32 %v1161_v55, %v1146_v36 }
 0x270   : > { %1180 = vst [vmem:[%s1964_s7 + $0x18] sm:$0xff] %v1176_v15 }
 0x271   : > { %1178 = vst [vmem:[%s1964_s7 + $0x8] sm:$0xff] %v1174_v2 }
 0x272 PF: > { %1187 = sbr.rel (!%p1913_p10) target bundleno = 638 (0x27e), region = 139  ;;  %s1493_s17 = sshll.u32 (%p1913_p10), %s1751_s30, 3  ;;  %v1226_v19 = vld [vmem:[%s1964_s7] sm:$0xff] (%p1913_p10)  ;;  %v1230_v40 = vld [vmem:[%s1964_s7 + $0x10] sm:$0xff] (%p1913_p10) }
 0x273   : > { %s1189_s14 = sadd.s32 (%p1913_p10), %s1747_s29, %s1493_s17  ;;  %s2284_s24 = sld [smem:[#allocation15_spill]] (%p1913_p10) }
 0x274   : > { %s1494_s12 = sshll.u32 (%p1913_p10), %s1189_s14, 3 }
 0x277   : > { %v1232_v59 = vld [vmem:[%s1964_s7 + $0x18] sm:$0xff] }
 0x278   : > { %v1228_v58 = vld [vmem:[%s1964_s7 + $0x8] sm:$0xff] }
 0x279   : > { %s1191_s26 = scalar_lea.vmem %s2284_s24, %s1494_s12 }
 0x27a   : > { %1227 = vst [vmem:[%s1191_s26] sm:$0xff] %v1226_v19 }
 0x27b   : > { %1229 = vst [vmem:[%s1191_s26 + $0x10] sm:$0xff] %v1228_v58 }
 0x27c   : > { %1231 = vst [vmem:[%s1191_s26 + $0x20] sm:$0xff] %v1230_v40 }
 0x27d   : > { %1233 = vst [vmem:[%s1191_s26 + $0x30] sm:$0xff] %v1232_v59 }
 0x27e PF: > { %s17_s11 = sadd.s32 1, %s1767_s11   ;;  %s2285_s29 = sld [smem:[#allocation11_spill]] }
 0x27f   : > { %p14_p5 = scmp.ge.s32.totalorder %s17_s11, 10   ;;  %s2286_s28 = sld [smem:[#allocation6_spill]] }
 0x280   : > { %s2287_s30 = sld [smem:[#allocation7_spill]]  ;;  %s2292_s24 = smov %s1731_s25 }
 0x281   : > { %s2288_s13 = sld [smem:[#allocation8_spill]]  ;;  %s2294_s26 = smov %s1739_s27 }
 0x282   : > { %s2289_s8 = sld [smem:[#allocation9_spill]]  ;;  %s2295_s27 = smov %s1918_s19 }
 0x283   : > { %s2290_s9 = sld [smem:[#allocation10_spill]]  ;;  %16 = sbr.rel (!%p14_p5) target bundleno = 10 (0xa), region = 228 }
 0x284   : > { %s2291_s10 = sld [smem:[#allocation12_spill]]  ;;  %s2293_s25 = smov %s2285_s29 }
 0x286   : > { %s2296_s29 = smov %s2287_s30 }
 0x287   : > { %s2297_s30 = smov %s2288_s13 }

</bundles_post_ra>
